<compile_context>
chip_gen: v6e
topology: v6e:2x2x1
jax: 0.10.0
libtpu: 0.0.40
codegen_flags: <defaults>
</compile_context>

<pallas_src>
import functools

import jax
import jax.numpy as jnp
from jax import lax
from jax.experimental import pallas as pl
from jax.experimental.pallas import tpu as pltpu

LANES = 128
SUBLANES = 8
ROW_TILE = 2048                # 2048*128*4 B = 1 MiB f32 per input per block
SINGLE_BLOCK_MAX_ROWS = ROW_TILE
NUM_CORE_SPLITS = 2            # leading "parallel" grid axis (v7x megacore)
EPS = 1e-07


def _recip(denom):
    """EUP reciprocal + one Newton step (~1e-7 relative error)."""
    inv = pl.reciprocal(denom, approx=True)
    return inv * (jnp.float32(2.0) - denom * inv)


def _mape_single_kernel(pred_ref, true_ref, out_ref, *, scale):
    """Whole problem in one VMEM block: sum once, write scalar."""
    yt = true_ref[...].astype(jnp.float32)
    yp = pred_ref[...].astype(jnp.float32)
    diff = jnp.abs((yt - yp) * _recip(yt + jnp.float32(EPS)))
    # Wrapper zero-padding is self-masking: |0-0|/(0+eps) == 0.
    out_ref[0] = jnp.sum(diff) * jnp.float32(scale)


def _mape_tiled_kernel(pred_ref, true_ref, out_ref, acc_ref, *, scale,
                       tiles_per_core, n_tiles_total, valid_rows_last,
                       need_mask, has_phantom):
    """Streaming reduction; one partial sum per core (leading grid axis)."""
    c = pl.program_id(0)                 # core split index
    j = pl.program_id(1)                 # per-core tile index
    t = c * tiles_per_core + j           # global tile index

    @pl.when(j == 0)
    def _():
        acc_ref[...] = jnp.zeros_like(acc_ref)

    yt = true_ref[...].astype(jnp.float32)
    yp = pred_ref[...].astype(jnp.float32)
    diff = jnp.abs((yt - yp) * _recip(yt + jnp.float32(EPS)))

    def _accumulate(d):
        # Sublane-group tree sum: accumulator stays a single vreg; same number
        # of VPU adds, no full-block scratch traffic.
        acc_ref[...] += d.reshape(-1, SUBLANES, LANES).sum(axis=0)

    if not need_mask and not has_phantom:
        # Hot path for well-shaped inputs: no masks, no selects.
        _accumulate(diff)
    elif need_mask:
        is_last = t == (n_tiles_total - 1)

        @pl.when(is_last)
        def _():
            # Only the last real tile can be ragged; local row indices only
            # (no global flat index -> no int32 overflow for huge inputs).
            row_ids = lax.broadcasted_iota(jnp.int32, diff.shape, 0)
            _accumulate(jnp.where(row_ids < valid_rows_last, diff,
                                  jnp.float32(0.0)))

        full_cond = jnp.logical_not(is_last)
        if has_phantom:
            full_cond = jnp.logical_and(full_cond, t < n_tiles_total)

        @pl.when(full_cond)
        def _():
            _accumulate(diff)
    else:
        # Odd tile count only: skip the duplicated (clamped) phantom tile.
        @pl.when(t < n_tiles_total)
        def _():
            _accumulate(diff)

    @pl.when(j == pl.num_programs(1) - 1)
    def _():
        out_ref[0] = jnp.sum(acc_ref[...]) * jnp.float32(scale)


def _cdiv(a, b):
    return -(-a // b)


def mape_loss(y_pred, y_true):
    """MAPELoss.forward equivalent. Returns a float32 scalar."""
    assert y_pred.shape == y_true.shape
    total_n = int(y_pred.size)
    scale = 100.0 / total_n  # precomputed finalize constant

    # Keep native dtype (kernel upcasts while streaming): halves HBM traffic
    # for bf16/fp8 inputs on this memory-bound kernel.
    flat_pred = jnp.ravel(y_pred)
    flat_true = jnp.ravel(y_true)

    # Pad only the lane tail (<=127 elems). Zero padding contributes nothing
    # to the sum, so no in-kernel mask is needed for it.  For the target
    # (2,4,16,16) shape (2048 elems) no padding happens.
    rem = total_n % LANES
    if rem:
        pad_amt = LANES - rem
        flat_pred = jnp.pad(flat_pred, (0, pad_amt))
        flat_true = jnp.pad(flat_true, (0, pad_amt))
    rows = flat_pred.shape[0] // LANES
    pred2d = flat_pred.reshape(rows, LANES)
    true2d = flat_true.reshape(rows, LANES)

    if rows <= SINGLE_BLOCK_MAX_ROWS:
        # Single grid-less block: zero pipelining / per-step overhead.
        kernel = functools.partial(_mape_single_kernel, scale=scale)
        out = pl.pallas_call(
            kernel,
            out_shape=jax.ShapeDtypeStruct((1,), jnp.float32),
            in_specs=[
                pl.BlockSpec(memory_space=pltpu.VMEM),
                pl.BlockSpec(memory_space=pltpu.VMEM),
            ],
            out_specs=pl.BlockSpec(memory_space=pltpu.SMEM),
        )(pred2d, true2d)
        return out[0]

    # Large-input path: tiled streaming reduction, split across 2 cores.
    n_tiles = _cdiv(rows, ROW_TILE)
    tiles_per_core = _cdiv(n_tiles, NUM_CORE_SPLITS)
    has_phantom = (NUM_CORE_SPLITS * tiles_per_core != n_tiles)
    valid_rows_last = rows - (n_tiles - 1) * ROW_TILE
    need_mask = (valid_rows_last != ROW_TILE)

    if has_phantom:
        # Clamp the (single) phantom tile of the last core to a valid block;
        # its contribution is skipped inside the kernel.
        def in_map(c, j):
            return (jnp.minimum(c * tiles_per_core + j, n_tiles - 1), 0)
    else:
        def in_map(c, j):
            return (c * tiles_per_core + j, 0)

    kernel = functools.partial(
        _mape_tiled_kernel, scale=scale, tiles_per_core=tiles_per_core,
        n_tiles_total=n_tiles, valid_rows_last=valid_rows_last,
        need_mask=need_mask, has_phantom=has_phantom)

    partials = pl.pallas_call(
        kernel,
        out_shape=jax.ShapeDtypeStruct((NUM_CORE_SPLITS,), jnp.float32),
        grid_spec=pltpu.PrefetchScalarGridSpec(
            num_scalar_prefetch=0,
            grid=(NUM_CORE_SPLITS, tiles_per_core),
            in_specs=[
                pl.BlockSpec((ROW_TILE, LANES), in_map),
                pl.BlockSpec((ROW_TILE, LANES), in_map),
            ],
            out_specs=pl.BlockSpec((1,), lambda c, j: (c,),
                                   memory_space=pltpu.SMEM),
            scratch_shapes=[pltpu.VMEM((SUBLANES, LANES), jnp.float32)],
        ),
        compiler_params=pltpu.CompilerParams(
            dimension_semantics=("parallel", "arbitrary"),
            vmem_limit_bytes=32 * 1024 * 1024,  # v7x-safe (64 MiB physical)
        ),
    )(pred2d, true2d)
    return partials[0] + partials[1]


if __name__ == "__main__":
    key = jax.random.PRNGKey(0)
    k1, k2 = jax.random.split(key)
    # NCHW inputs, as the PyTorch module would typically receive.
    y_pred = jax.random.normal(k1, (2, 4, 16, 16), dtype=jnp.float32)
    y_true = jax.random.normal(k2, (2, 4, 16, 16), dtype=jnp.float32) + 2.0

    result = jax.block_until_ready(mape_loss(y_pred, y_true))
    ref = jnp.mean(jnp.abs((y_true - y_pred) / (y_true + EPS))) * 100.0
    assert jnp.allclose(result, ref, rtol=1e-5, atol=1e-4), (result, ref)

    # Also exercise the tiled path (ragged lanes + ragged rows + odd tile
    # count -> mask and phantom-tile branches) to verify the large-input code.
    n_big = (2 * ROW_TILE + 1000) * LANES + 37
    kb1, kb2 = jax.random.split(jax.random.PRNGKey(1))
    big_pred = jax.random.normal(kb1, (n_big,), dtype=jnp.float32)
    big_true = jax.random.normal(kb2, (n_big,), dtype=jnp.float32) + 2.0
    big_res = jax.block_until_ready(mape_loss(big_pred, big_true))
    big_ref = jnp.mean(jnp.abs((big_true - big_pred) / (big_true + EPS))) * 100.0
    assert jnp.allclose(big_res, big_ref, rtol=1e-5, atol=1e-4), (big_res, big_ref)

    print("KERNEL_OK")
</pallas_src>

<mosaic_0001>
module attributes {stable_mosaic.version = 11 : i64} {
  func.func @_mape_single_kernel(%arg0: memref<16x128xf32, #tpu.memory_space<vmem>>, %arg1: memref<16x128xf32, #tpu.memory_space<vmem>>, %arg2: memref<1xf32, #tpu.memory_space<smem>>) attributes {dimension_semantics = [], scalar_prefetch = 0 : i64, scratch_operands = 0 : i64, tpu.core_type = #tpu.core_type<tc>} {
    %c0 = arith.constant 0 : index
    %c0_0 = arith.constant 0 : index
    %0 = vector.load %arg1[%c0, %c0_0] : memref<16x128xf32, #tpu.memory_space<vmem>>, vector<16x128xf32>
    %c0_1 = arith.constant 0 : index
    %c0_2 = arith.constant 0 : index
    %1 = vector.load %arg0[%c0_1, %c0_2] : memref<16x128xf32, #tpu.memory_space<vmem>>, vector<16x128xf32>
    %2 = arith.subf %0, %1 : vector<16x128xf32>
    %cst = arith.constant 1.000000e-07 : f32
    %3 = vector.broadcast %cst : f32 to vector<16x128xf32>
    %4 = arith.addf %0, %3 : vector<16x128xf32>
    %5 = tpu.reciprocal %4 {approx = true} : vector<16x128xf32> -> vector<16x128xf32>
    %6 = arith.mulf %4, %5 : vector<16x128xf32>
    %cst_3 = arith.constant 2.000000e+00 : f32
    %7 = vector.broadcast %cst_3 : f32 to vector<16x128xf32>
    %8 = arith.subf %7, %6 : vector<16x128xf32>
    %9 = arith.mulf %5, %8 : vector<16x128xf32>
    %10 = arith.mulf %2, %9 : vector<16x128xf32>
    %11 = math.absf %10 : vector<16x128xf32>
    %12 = vector.shape_cast %11 : vector<16x128xf32> to vector<1x16x128xf32>
    %cst_4 = arith.constant dense<0.000000e+00> : vector<1xf32>
    %13 = vector.multi_reduction <add>, %12, %cst_4 [1, 2] : vector<1x16x128xf32> to vector<1xf32>
    %14 = vector.shape_cast %13 : vector<1xf32> to vector<1x1x1xf32>
    %15 = vector.extract %14[0, 0, 0] : f32 from vector<1x1x1xf32>
    %cst_5 = arith.constant 0.048828125 : f32
    %16 = arith.mulf %15, %cst_5 : f32
    %c0_6 = arith.constant 0 : index
    %17 = memref.load %arg2[%c0_6] : memref<1xf32, #tpu.memory_space<smem>>
    memref.store %16, %arg2[%c0_6] : memref<1xf32, #tpu.memory_space<smem>>
    return
  }
}

</mosaic_0001>

<bundles_post_ra>
// kernel: tpu_custom_call.1
= control target key start
LH: loop header
LB: loop body
LE: loop exit
PB: predicated region body
PF: predicated region fallthrough
CT: control target
= control target key end

     0   :  { %7 = vsyncpa [#allocation3], 0  ;;  %s182_s0 = inlined_call_operand.hbm [shape: f32[16,128], index: 0, kind: input, shape index: {}]   ;;  %s183_s1 = inlined_call_operand.hbm [shape: f32[16,128], index: 1, kind: input, shape index: {}]   ;;  %s184_s2 = inlined_call_operand.hbm [shape: f32[1], index: 2, kind: output, shape index: {}]  }
   0x1   :  { %8 = vsyncpa [#allocation6], 0 }
   0x2   :  { %9 = vsyncpa [#allocation4], 0  ;;  %s153_s9 = smov [#allocation2]  }
   0x3   :  { %s15_s10 = sshll.u32 %s153_s9, 4  ;;  %s16_s10 = int_to_ptr.vmem [resolvable:$true] %s15_s10 }
   0x4   :  { %s107_s11 = scalar_lea.vmem %s16_s10, 256  ;;  %p112_p1 = scmp.lt.s32.totalorder %s16_s10, %s16_s10 }
   0x5   :  { %p108_p0 = scmp.ne.s32.totalorder %s16_s10, %s107_s11  ;;  %p113_p2 = scmp.lt.s32.totalorder %s107_s11, %s107_s11 }
   0x7   :  { %p114_p3 = por %p113_p2, %p112_p1 }
   0x9   :  { %p115_p4 = pnand %p114_p3, %p108_p0 }
   0xb   :  { %118 = shalt.err (!%p115_p4)
}
   0xc   :  { %s154_s12 = smov 128   ;;  %s155_s13 = smov 8  }
   0xd   :  { %21 = dma.hbm_to_vmem [thread:$0]  %s182_s0, 256, %s16_s10, [#allocation3], %s154_s12, %s154_s12, %s155_s13  }
   0xe   :  { %s156_s16 = smov [#allocation5]  }
   0xf   :  { %s27_s17 = sshll.u32 %s156_s16, 4  ;;  %s28_s17 = int_to_ptr.vmem [resolvable:$true] %s27_s17 }
  0x10   :  { %s127_s18 = scalar_lea.vmem %s28_s17, 256  ;;  %p132_p6 = scmp.lt.s32.totalorder %s28_s17, %s28_s17 }
  0x11   :  { %p128_p5 = scmp.ne.s32.totalorder %s28_s17, %s127_s18  ;;  %p133_p7 = scmp.lt.s32.totalorder %s127_s18, %s127_s18 }
  0x13   :  { %p134_p8 = por %p133_p7, %p132_p6 }
  0x15   :  { %p135_p9 = pnand %p134_p8, %p128_p5 }
  0x17   :  { %138 = shalt.err (!%p135_p9)
}
  0x18   :  { %33 = dma.hbm_to_vmem [thread:$0]  %s183_s1, 256, %s28_s17, [#allocation6], %s154_s12, %s154_s12, %s155_s13  }
  0x19   :  { %147 = dma.done.wait [#allocation3], 256  }
  0x1a   :  { %148 = vsyncadd [#allocation3], 4294967040 }
  0x1b   :  { %149 = dma.done.wait [#allocation6], 256  }
  0x1c   :  { %150 = vsyncadd [#allocation6], 4294967040  ;;  %v40_v0 = vld [vmem:[#allocation5] sm:$0xff]  ;;  %v41_v1 = vld [vmem:[#allocation5 + $0x8] sm:$0xff]  ;;  %s157_s21 = smov [#allocation7]  }
  0x1d   :  { %v46_v2 = vadd.f32 1e-07, %v40_v0  ;;  %v47_v3 = vadd.f32 1e-07, %v41_v1  ;;  %v42_v5 = vld [vmem:[#allocation2] sm:$0xff]  ;;  %v43_v7 = vld [vmem:[#allocation2 + $0x8] sm:$0xff] }
  0x1e   :  { %v44_v10 = vsub.f32 %v40_v0, %v42_v5  ;;  %v45_v12 = vsub.f32 %v41_v1, %v43_v7 }
  0x1f   :  { %95 = vrcp.f32 %v46_v2 }
  0x20   :  { %97 = vrcp.f32 %v47_v3 }
  0x2c   :  { %v96_v4 = vpop.eup %95 }
  0x2d   :  { %v98_v6 = vpop.eup %97  ;;  %v50_v8 = vmul.f32 %v96_v4, %v46_v2 }
  0x2e   :  { %v51_v9 = vmul.f32 %v98_v6, %v47_v3 }
  0x2f   :  { %v52_v11 = vsub.f32 2.0, %v50_v8 }
  0x30   :  { %v53_v13 = vsub.f32 2.0, %v51_v9 }
  0x31   :  { %v54_v14 = vmul.f32 %v96_v4, %v52_v11 }
  0x32   :  { %v55_v15 = vmul.f32 %v98_v6, %v53_v13 }
  0x33   :  { %v56_v16 = vmul.f32 %v54_v14, %v44_v10 }
  0x34   :  { %v57_v17 = vmul.f32 %v55_v15, %v45_v12 }
  0x35   :  { %v58_v18 = vand.u32 2147483647, %v56_v16 }
  0x36   :  { %v59_v19 = vand.u32 2147483647, %v57_v17 }
  0x38   :  { %v60_v20 = vadd.f32 %v59_v19, %v58_v18 }
  0x3a   :  { %61 = vadd.xlane.f32.xlu0 %v60_v20 }
  0xc3   :  { %v62_v21 = vpop.xlane.xlu0 %61 }
  0xc4   :  { %v63_v22 = vrot.slane %v62_v21, 4 }
  0xc6   :  { %v64_v23 = vadd.f32 %v63_v22, %v62_v21 }
  0xc8   :  { %v65_v24 = vrot.slane %v64_v23, 2 }
  0xca   :  { %v66_v25 = vadd.f32 %v65_v24, %v64_v23 }
  0xcc   :  { %v67_v26 = vrot.slane %v66_v25, 1 }
  0xce   :  { %v68_v27 = vadd.f32 %v67_v26, %v66_v25 }
  0xd0   :  { %88 = vpush %v68_v27 }
 0x101   :  { %s89_s0 = spop %88 }
 0x102   :  { %s70_s1 = smul.f32 0.048828125, %s89_s0 }
 0x104   :  { %72 = sst [smem:[#allocation7]] %s70_s1 }
 0x105   :  { %80 = dma.smem_to_hbm %s157_s21, 16, %s184_s2, [#allocation4]  }
 0x106   :  { %151 = dma.done.wait [#allocation4], 16  }
 0x107   :  { %152 = vsyncadd [#allocation4], 4294967280 }
 0x108   :  { %84 = sfence }
 0x109   :  { %85 = vsyncpa [#allocation3], 1 }
 0x10a   :  { %86 = vsyncpa [#allocation6], 1 }
 0x10b   :  { %87 = vsyncpa [#allocation4], 1 }

</bundles_post_ra>
